<compile_context>
chip_gen: v7x
topology: tpu7x:2x2x1
jax: 0.10.0
libtpu: 0.0.40
codegen_flags: <defaults>
</compile_context>

<pallas_src>
import jax
import jax.numpy as jnp
from jax.experimental import pallas as pl
from jax.experimental.pallas import tpu as pltpu

_LANES = 128
_BLOCK_ROWS = 4096  # 4096 * 128 * 4 B = 2 MiB per f32 block (tiled path)


def _gelu_tanh(x):
    # tanh-approximation GELU, computed in f32 for accuracy.
    # TODO(synk): PyTorch's default nn.GELU is erf-based; Apply() is generic,
    # so the tanh approximation is used here as the representative f.
    if x.dtype != jnp.float32:
        x = x.astype(jnp.float32)
    c = jnp.sqrt(2.0 / jnp.pi).astype(jnp.float32)
    return 0.5 * x * (1.0 + jnp.tanh(c * (x + 0.044715 * x * x * x)))


def apply_kernel(x_ref, o_ref):
    o_ref[...] = _gelu_tanh(x_ref[...]).astype(o_ref.dtype)


def apply_f(x: jax.Array) -> jax.Array:
    """Apply(f) with f = GELU, as a Pallas TPU kernel. Any input shape."""
    orig_shape = x.shape
    orig_dtype = x.dtype
    n_total = x.size

    # Lane-dense flatten: (rows, 128).  Pad the tail lane if needed
    # (GELU(0) = 0, and the padding is sliced off anyway).
    n_padded = ((n_total + _LANES - 1) // _LANES) * _LANES
    flat = x.reshape(-1)
    if n_padded != n_total:
        flat = jnp.pad(flat, (0, n_padded - n_total))
    rows = n_padded // _LANES

    if rows <= _BLOCK_ROWS:
        # Small case (the 2x4x16x16 input -> (16, 128)): single full-array
        # VMEM block, no grid, no pipeline machinery.
        x2d = flat.reshape(rows, _LANES)
        out2d = pl.pallas_call(
            apply_kernel,
            out_shape=jax.ShapeDtypeStruct((rows, _LANES), orig_dtype),
        )(x2d)
    else:
        # Large case: grid over rows with lane-dense ~2 MiB blocks,
        # grid axis "parallel" (v7x: shard across both TensorCores).
        rows_padded = ((rows + _BLOCK_ROWS - 1) // _BLOCK_ROWS) * _BLOCK_ROWS
        if rows_padded != rows:
            flat = jnp.pad(flat, (0, (rows_padded - rows) * _LANES))
        x2d = flat.reshape(rows_padded, _LANES)
        out2d = pl.pallas_call(
            apply_kernel,
            out_shape=jax.ShapeDtypeStruct((rows_padded, _LANES), orig_dtype),
            grid=(rows_padded // _BLOCK_ROWS,),
            in_specs=[pl.BlockSpec((_BLOCK_ROWS, _LANES), lambda i: (i, 0))],
            out_specs=pl.BlockSpec((_BLOCK_ROWS, _LANES), lambda i: (i, 0)),
            compiler_params=pltpu.CompilerParams(
                dimension_semantics=("parallel",)
            ),
        )(x2d)

    out_flat = out2d.reshape(-1)[:n_total]
    return out_flat.reshape(orig_shape)


if __name__ == "__main__":
    key = jax.random.PRNGKey(0)
    # NCHW input, consistent with the PyTorch convention.
    x = jax.random.normal(key, (2, 4, 16, 16), dtype=jnp.float32)

    out = apply_f(x)
    jax.block_until_ready(out)

    # Sanity check against the pure-JAX reference of f(x).
    ref = _gelu_tanh(x).astype(x.dtype)
    assert out.shape == x.shape and out.dtype == x.dtype
    assert jnp.max(jnp.abs(out - ref)) < 1e-5

    print("KERNEL_OK")
</pallas_src>

<mosaic_0001>
module attributes {stable_mosaic.version = 11 : i64} {
  func.func @apply_kernel(%arg0: memref<16x128xf32, #tpu.memory_space<vmem>>, %arg1: memref<16x128xf32, #tpu.memory_space<vmem>>) attributes {dimension_semantics = [], scalar_prefetch = 0 : i64, scratch_operands = 0 : i64, tpu.core_type = #tpu.core_type<tc>} {
    %c0 = arith.constant 0 : index
    %c0_0 = arith.constant 0 : index
    %0 = vector.load %arg0[%c0, %c0_0] : memref<16x128xf32, #tpu.memory_space<vmem>>, vector<16x128xf32>
    %cst = arith.constant 0.636619746 : f32
    %1 = math.sqrt %cst : f32
    %cst_1 = arith.constant 5.000000e-01 : f32
    %2 = vector.broadcast %cst_1 : f32 to vector<16x128xf32>
    %3 = arith.mulf %2, %0 : vector<16x128xf32>
    %cst_2 = arith.constant 4.471500e-02 : f32
    %4 = vector.broadcast %cst_2 : f32 to vector<16x128xf32>
    %5 = arith.mulf %4, %0 : vector<16x128xf32>
    %6 = arith.mulf %5, %0 : vector<16x128xf32>
    %7 = arith.mulf %6, %0 : vector<16x128xf32>
    %8 = arith.addf %0, %7 : vector<16x128xf32>
    %9 = vector.broadcast %1 : f32 to vector<16x128xf32>
    %10 = arith.mulf %9, %8 : vector<16x128xf32>
    %11 = math.tanh %10 : vector<16x128xf32>
    %cst_3 = arith.constant 1.000000e+00 : f32
    %12 = vector.broadcast %cst_3 : f32 to vector<16x128xf32>
    %13 = arith.addf %12, %11 : vector<16x128xf32>
    %14 = arith.mulf %3, %13 : vector<16x128xf32>
    %c0_4 = arith.constant 0 : index
    %c0_5 = arith.constant 0 : index
    %15 = vector.load %arg1[%c0_4, %c0_5] : memref<16x128xf32, #tpu.memory_space<vmem>>, vector<16x128xf32>
    tpu.vector_store %arg1[%c0_4, %c0_5], %14 {strides = array<i32>} : memref<16x128xf32, #tpu.memory_space<vmem>>, vector<16x128xf32>,
    return
  }
}

</mosaic_0001>

<bundles_post_ra>
// kernel: tpu_custom_call.1
= control target key start
LH: loop header
LB: loop body
LE: loop exit
PB: predicated region body
PF: predicated region fallthrough
CT: control target
= control target key end

     0   :  { %6 = vsyncpa [#allocation3], 0  ;;  %s162_s0 = inlined_call_operand.hbm [shape: f32[16,128], index: 0, kind: input, shape index: {}]   ;;  %s163_s1 = inlined_call_operand.hbm [shape: f32[16,128], index: 1, kind: output, shape index: {}]  }
   0x1   :  { %7 = vsyncpa [#allocation4], 0  ;;  %s118_s6 = smov [#allocation2]   ;;  %s70_s10 = scalar_lea.hbm %s162_s0, 256 }
   0x2   :  { %s13_s7 = sshll.u32 %s118_s6, 4  ;;  %p71_p0 = scmp.ne.s32.totalorder %s162_s0, %s70_s10  ;;  %s14_s7 = int_to_ptr.vmem [resolvable:$true] %s13_s7 }
   0x3   :  { %p74_p1 = scmp.lt.u32.totalorder %s70_s10, %s162_s0 }
   0x5   :  { %p76_p2 = pnand %p74_p1, %p71_p0 }
   0x7   :  { %79 = shalt.err (!%p76_p2)
}
   0x8   :  { %s80_s15 = scalar_lea.vmem %s14_s7, 256  ;;  %p85_p4 = scmp.lt.s32.totalorder %s14_s7, %s14_s7 }
   0x9   :  { %p81_p3 = scmp.ne.s32.totalorder %s14_s7, %s80_s15  ;;  %p86_p5 = scmp.lt.s32.totalorder %s80_s15, %s80_s15 }
   0xb   :  { %p87_p6 = por %p86_p5, %p85_p4 }
   0xd   :  { %p88_p7 = pnand %p87_p6, %p81_p3 }
   0xf   :  { %91 = shalt.err (!%p88_p7)
}
  0x10   :  { %s119_s16 = smov 128   ;;  %s120_s17 = smov 8  }
  0x11   :  { %19 = dma.hbm_to_vmem [thread:$0]  %s162_s0, 256, %s14_s7, [#allocation3], %s119_s16, %s119_s16, %s120_s17  }
  0x12   :  { %114 = dma.done.wait [#allocation3], 256  }
  0x13   :  { %115 = vsyncadd [#allocation3], 4294967040  ;;  %v23_v0 = vld [vmem:[#allocation2] sm:$0xff]  ;;  %v24_v1 = vld [vmem:[#allocation2 + $0x8] sm:$0xff]  ;;  %s121_s0 = smov [#allocation5]  }
  0x14   :  { %v27_v2 = vmul.f32 0.044715, %v23_v0  ;;  %v28_v3 = vmul.f32 0.044715, %v24_v1  ;;  %v25_v12 = vmul.f32 0.5, %v23_v0  ;;  %v26_v14 = vmul.f32 0.5, %v24_v1 }
  0x15   :  { %s50_s20 = sshll.u32 %s121_s0, 4  ;;  %s51_s20 = int_to_ptr.vmem [resolvable:$true] %s50_s20 }
  0x16   :  { %v29_v4 = vmul.f32 %v27_v2, %v23_v0  ;;  %v30_v5 = vmul.f32 %v28_v3, %v24_v1  ;;  %s92_s21 = scalar_lea.vmem %s51_s20, 256  ;;  %p97_p9 = scmp.lt.s32.totalorder %s51_s20, %s51_s20 }
  0x17   :  { %p93_p8 = scmp.ne.s32.totalorder %s51_s20, %s92_s21  ;;  %p98_p10 = scmp.lt.s32.totalorder %s92_s21, %s92_s21 }
  0x18   :  { %v31_v6 = vmul.f32 %v29_v4, %v23_v0  ;;  %v32_v7 = vmul.f32 %v30_v5, %v24_v1 }
  0x19   :  { %p99_p11 = por %p98_p10, %p97_p9 }
  0x1a   :  { %v33_v8 = vadd.f32 %v31_v6, %v23_v0  ;;  %v34_v9 = vadd.f32 %v32_v7, %v24_v1 }
  0x1b   :  { %p100_p12 = pnand %p99_p11, %p93_p8 }
  0x1c   :  { %v35_v10 = vmul.f32 0.7978845, %v33_v8  ;;  %v36_v11 = vmul.f32 0.7978845, %v34_v9 }
  0x1e   :  { %66 = vtanh.f32 %v35_v10 }
  0x1f   :  { %68 = vtanh.f32 %v36_v11 }
  0x28   :  { %v67_v13 = vpop.eup %66 }
  0x29   :  { %v69_v15 = vpop.eup %68  ;;  %v39_v16 = vadd.f32 1.0, %v67_v13 }
  0x2a   :  { %v40_v17 = vadd.f32 1.0, %v69_v15 }
  0x2b   :  { %v41_v18 = vmul.f32 %v39_v16, %v25_v12 }
  0x2c   :  { %v42_v19 = vmul.f32 %v40_v17, %v26_v14 }
  0x2d   :  { %43 = vst [vmem:[#allocation5] sm:$0xff] %v41_v18 }
  0x2e   :  { %44 = vst [vmem:[#allocation5 + $0x8] sm:$0xff] %v42_v19 }
  0x2f   :  { %103 = shalt.err (!%p100_p12)
}
  0x30   :  { %s104_s24 = scalar_lea.hbm %s163_s1, 256 }
  0x31   :  { %p105_p13 = scmp.ne.s32.totalorder %s163_s1, %s104_s24  ;;  %p108_p0 = scmp.lt.u32.totalorder %s104_s24, %s163_s1 }
  0x33   :  { %p110_p1 = pnand %p108_p0, %p105_p13 }
  0x35   :  { %113 = shalt.err (!%p110_p1)
}
  0x36   :  { %56 = dma.vmem_to_hbm [thread:$0]  %s51_s20, 256, %s163_s1, [#allocation4], %s119_s16, %s119_s16, %s120_s17  }
  0x37   :  { %116 = dma.done.wait [#allocation4], 256  }
  0x38   :  { %117 = vsyncadd [#allocation4], 4294967040 }
  0x39   :  { %60 = vsyncpa [#allocation3], 1 }
  0x3a   :  { %61 = vsyncpa [#allocation4], 1 }

</bundles_post_ra>
